<compile_context>
chip_gen: v7x
topology: tpu7x:2x2x1
jax: 0.10.0
libtpu: 0.0.40
codegen_flags: <defaults>
</compile_context>

<pallas_src>
import math
from functools import partial

import jax
import jax.numpy as jnp
from jax import lax
from jax.experimental import pallas as pl
from jax.experimental.pallas import tpu as pltpu
from jax.scipy.special import erf as _erf_exact


_SQRT_HALF = 1.0 / math.sqrt(2.0)


# ------------------------------ Pallas kernel ------------------------------ #

def _erf_poly(x):
    """erf via Abramowitz & Stegun 7.1.26 (|err| <= 1.5e-7).

    Keeps nn.GELU()'s exact-erf semantics using only mul/add/exp/where
    (no reliance on an erf lowering inside Mosaic)."""
    a1, a2, a3, a4, a5 = (0.254829592, -0.284496736, 1.421413741,
                          -1.453152027, 1.061405429)
    p = 0.3275911
    ax = jnp.abs(x)
    t = 1.0 / (1.0 + p * ax)
    poly = ((((a5 * t + a4) * t + a3) * t + a2) * t + a1) * t
    e = 1.0 - poly * jnp.exp(-(ax * ax))
    return jnp.where(x < 0.0, -e, e)


def _conv_bn_act_kernel(q_ref, w_ref, s_ref, b_ref, o_ref, *, cout_pad, apply_gelu):
    """(TILE, 6*Cin) @ (6*Cin, 2*Cout_pad) on the MXU, row-shift combine,
    folded-BN affine + optional exact GELU on the VPU/EUP."""
    yz = jnp.dot(q_ref[...], w_ref[...], preferred_element_type=jnp.float32)
    y = yz[:, :cout_pad]            # taps kw=0,1 of pair j
    z = yz[:, cout_pad:]            # tap  kw=2  -> belongs to output column j-1
    # out[r] = y[r] + z[r+1].  TILE % (Wo+1) == 0, so the last row of every tile
    # is a dropped "pair == Wo" row and the wrap-around value is never used.
    z_up = jnp.concatenate([z[1:, :], z[:1, :]], axis=0)
    acc = y + z_up
    acc = acc * s_ref[...] + b_ref[...]          # folded BatchNorm2d (inference)
    if apply_gelu:
        acc = 0.5 * acc * (1.0 + _erf_poly(acc * _SQRT_HALF))
    o_ref[...] = acc.astype(o_ref.dtype)


# --------------------------- per-layer Pallas call -------------------------- #

def _pick_tile(m_rows, pair_cols, lhs_bytes_per_row, out_bytes_per_row):
    # TILE must be a multiple of (Wo+1) (dropped pair lands on the tile's last
    # row) and of 16 (bf16 sublane packing).  Aim for ~2 MiB of LHS+output per
    # tile so double-buffered tiles pipeline well while staying far under the
    # 32 MiB scoped-VMEM budget (safe on v5e/v6e/v7x).
    step = math.lcm(16, pair_cols)
    per_row = max(lhs_bytes_per_row + out_bytes_per_row, 1)
    target_rows = max(256, min(4096, (2 * 1024 * 1024) // per_row))
    units_needed = -(-m_rows // step)
    units_target = max(1, target_rows // step)
    return step * min(units_needed, units_target)


def _conv3x3_bn_act(x_nhwc, layer):
    """One conv3x3(stride 2, pad 1) + folded BN [+ GELU] block."""
    b, h, w, c = x_nhwc.shape
    assert h % 2 == 0 and w % 2 == 0, "stride-2 stages expect even spatial dims"
    ho, wo = h // 2, w // 2
    k6 = 6 * c
    cp = layer["w_pk"].shape[1] // 2          # Cout padded to a multiple of 128
    cout = layer["cout"]

    # ---- glue (fused by XLA under jit): paired 3-row gather, ~1.5x input ----
    xp = jnp.pad(x_nhwc, ((0, 0), (1, 1), (1, 1), (0, 0)))
    qs = []
    for kh in range(3):
        r = xp[:, kh:kh + 2 * ho:2, :, :]                 # (B, Ho, W+2, C)
        qs.append(r.reshape(b, ho, wo + 1, 2 * c))        # pair j = cols (2j, 2j+1)
    q = jnp.concatenate(qs, axis=-1)                      # (B, Ho, Wo+1, 6C)
    m = b * ho * (wo + 1)
    q2d = q.reshape(m, k6).astype(jnp.bfloat16)           # bf16 MXU inputs

    tile = _pick_tile(m, wo + 1, k6 * 2, cp * 4)
    m_pad = -(-m // tile) * tile
    if m_pad != m:
        q2d = jnp.pad(q2d, ((0, m_pad - m), (0, 0)))

    out2d = pl.pallas_call(
        partial(_conv_bn_act_kernel, cout_pad=cp, apply_gelu=layer["gelu"]),
        out_shape=jax.ShapeDtypeStruct((m_pad, cp), jnp.float32),
        grid_spec=pltpu.PrefetchScalarGridSpec(
            num_scalar_prefetch=0,
            grid=(m_pad // tile,),
            in_specs=[
                pl.BlockSpec((tile, k6), lambda i: (i, 0)),     # pipelined row tile
                pl.BlockSpec((k6, 2 * cp), lambda i: (0, 0)),   # resident weights
                pl.BlockSpec((1, cp), lambda i: (0, 0)),        # resident BN scale
                pl.BlockSpec((1, cp), lambda i: (0, 0)),        # resident BN bias
            ],
            out_specs=pl.BlockSpec((tile, cp), lambda i: (i, 0)),
        ),
        compiler_params=pltpu.CompilerParams(
            dimension_semantics=("parallel",),   # shard row tiles across TCs on v7x
            vmem_limit_bytes=32 * 1024 * 1024,
        ),
    )(q2d, layer["w_pk"], layer["scale"], layer["bias"])

    # drop padded rows, the pair==Wo columns and the Cout padding (fused by XLA).
    return out2d[:m].reshape(b, ho, wo + 1, cp)[:, :, :wo, :cout]


def conv_patch_embed_forward(x_nchw, packed_layers):
    """Pallas forward.  Returns (x, (Hp, Wp)) like ConvPatchEmbed.forward."""
    x = jnp.transpose(x_nchw, (0, 2, 3, 1))               # NCHW -> NHWC
    for lyr in packed_layers:
        x = _conv3x3_bn_act(x, lyr)
    b, hp, wp, cc = x.shape
    return x.reshape(b, hp * wp, cc), (hp, wp)            # == flatten(2).transpose(1, 2)


# ------------------------- parameters & weight packing ---------------------- #

def make_params(key, in_chans, embed_dim, patch_size):
    """Deterministic synthetic params mirroring ConvPatchEmbed.__init__ shapes."""
    if patch_size == 16:
        chans = [in_chans, embed_dim // 8, embed_dim // 4, embed_dim // 2, embed_dim]
    elif patch_size == 8:
        chans = [in_chans, embed_dim // 4, embed_dim // 2, embed_dim]
    elif patch_size == 4:
        chans = [in_chans, embed_dim // 4, embed_dim]
    else:
        raise ValueError("For convolutional projection, patch size has to be in [4, 8, 16]")
    layers, n = [], len(chans) - 1
    for i in range(n):
        cin, cout = chans[i], chans[i + 1]
        key, kw_, kg, kb, km, kv = jax.random.split(key, 6)
        layers.append(dict(
            w=jax.random.normal(kw_, (cout, cin, 3, 3), jnp.float32) / math.sqrt(9 * cin),
            gamma=1.0 + 0.1 * jax.random.normal(kg, (cout,), jnp.float32),
            beta=0.1 * jax.random.normal(kb, (cout,), jnp.float32),
            mean=0.1 * jax.random.normal(km, (cout,), jnp.float32),
            var=1.0 + 0.1 * jax.random.uniform(kv, (cout,), jnp.float32),
            gelu=i < n - 1,                   # GELU after every block except the last
        ))
    return layers


def _fold_bn(gamma, beta, mean, var, eps=1e-5):
    # inference-mode BatchNorm folded into a per-channel affine
    scale = gamma / jnp.sqrt(var + eps)
    return scale, beta - mean * scale


def pack_layers(raw_layers, eps=1e-5):
    """Fold BN and pack conv weights into the (6*Cin, 2*Cout_pad) kernel layout."""
    packed = []
    for lyr in raw_layers:
        w = lyr["w"]                                        # (Cout, Cin, 3, 3) torch layout
        cout, cin = w.shape[0], w.shape[1]
        cout_pad = -(-cout // 128) * 128                    # lane-dense output stores
        w_hwio = jnp.transpose(w, (2, 3, 1, 0))             # (3, 3, Cin, Cout)
        zeros = jnp.zeros((cin, cout), w.dtype)
        y_rows, z_rows = [], []
        for kh in range(3):
            y_rows += [w_hwio[kh, 0], w_hwio[kh, 1]]        # taps kw=0,1 of pair j
            z_rows += [w_hwio[kh, 2], zeros]                # tap  kw=2 (consumed at j-1)
        pad = ((0, 0), (0, cout_pad - cout))
        w_pk = jnp.concatenate(
            [jnp.pad(jnp.concatenate(y_rows, 0), pad),
             jnp.pad(jnp.concatenate(z_rows, 0), pad)], axis=1).astype(jnp.bfloat16)
        scale, bias = _fold_bn(lyr["gamma"], lyr["beta"], lyr["mean"], lyr["var"], eps)
        packed.append(dict(
            w_pk=w_pk,
            scale=jnp.pad(scale, (0, cout_pad - cout)).reshape(1, cout_pad).astype(jnp.float32),
            bias=jnp.pad(bias, (0, cout_pad - cout)).reshape(1, cout_pad).astype(jnp.float32),
            cout=cout,
            gelu=lyr["gelu"],
        ))
    return packed


# ------------------------------ pure-JAX reference -------------------------- #

def reference_forward(x_nchw, raw_layers, eps=1e-5):
    """XLA reference (f32, exact erf GELU) for numerical validation."""
    x = jnp.transpose(x_nchw, (0, 2, 3, 1))
    for lyr in raw_layers:
        w_hwio = jnp.transpose(lyr["w"], (2, 3, 1, 0))
        x = lax.conv_general_dilated(x, w_hwio, window_strides=(2, 2),
                                     padding=((1, 1), (1, 1)),
                                     dimension_numbers=("NHWC", "HWIO", "NHWC"),
                                     precision=lax.Precision.HIGHEST)
        scale, bias = _fold_bn(lyr["gamma"], lyr["beta"], lyr["mean"], lyr["var"], eps)
        x = x * scale + bias
        if lyr["gelu"]:
            x = 0.5 * x * (1.0 + _erf_exact(x / math.sqrt(2.0)))
    b, hp, wp, c = x.shape
    return x.reshape(b, hp * wp, c), (hp, wp)


# ---------------------------------- main ------------------------------------ #

if __name__ == "__main__":
    B, C_IN, H, W = 2, 4, 16, 16
    EMBED_DIM, PATCH = 32, 4            # patch_size=4 branch: two conv3x3+BN blocks

    key = jax.random.PRNGKey(0)
    key, kx = jax.random.split(key)
    x = jax.random.normal(kx, (B, C_IN, H, W), jnp.float32)   # NCHW like torch

    raw_layers = make_params(key, C_IN, EMBED_DIM, PATCH)
    packed_layers = pack_layers(raw_layers)

    fwd = jax.jit(lambda inp: conv_patch_embed_forward(inp, packed_layers))
    out, (hp, wp) = fwd(x)
    out = jax.block_until_ready(out)
    hp, wp = int(hp), int(wp)

    ref, (hp_r, wp_r) = reference_forward(x, raw_layers)

    assert out.shape == (B, (H // PATCH) * (W // PATCH), EMBED_DIM), out.shape
    assert (hp, wp) == (H // PATCH, W // PATCH) == (hp_r, wp_r)
    assert bool(jnp.all(jnp.isfinite(out)))
    max_err = float(jnp.max(jnp.abs(out - ref)))
    assert max_err < 7.5e-2, f"mismatch vs reference: max abs err {max_err}"
    print("KERNEL_OK")
</pallas_src>

<mosaic_0001>
module attributes {stable_mosaic.version = 11 : i64} {
  func.func @_conv_bn_act_kernel(%arg0: i32, %arg1: memref<144x24xbf16, #tpu.memory_space<vmem>>, %arg2: memref<24x256xbf16, #tpu.memory_space<vmem>>, %arg3: memref<1x128xf32, #tpu.memory_space<vmem>>, %arg4: memref<1x128xf32, #tpu.memory_space<vmem>>, %arg5: memref<144x128xf32, #tpu.memory_space<vmem>>) attributes {dimension_semantics = [#tpu.dimension_semantics<parallel>], iteration_bounds = array<i64: 1>, scalar_prefetch = 0 : i64, scratch_operands = 0 : i64, tpu.core_type = #tpu.core_type<tc>, window_params = [{transform_indices = @transform_0, window_bounds = array<i64: 144, 24>}, {pipeline_mode = #tpu.pipeline_mode<synchronous>, transform_indices = @transform_1, window_bounds = array<i64: 24, 256>}, {pipeline_mode = #tpu.pipeline_mode<synchronous>, transform_indices = @transform_2, window_bounds = array<i64: 1, 128>}, {pipeline_mode = #tpu.pipeline_mode<synchronous>, transform_indices = @transform_3, window_bounds = array<i64: 1, 128>}, {transform_indices = @transform_4, window_bounds = array<i64: 144, 128>}]} {
    %c0 = arith.constant 0 : index
    %c0_0 = arith.constant 0 : index
    %0 = vector.load %arg1[%c0, %c0_0] : memref<144x24xbf16, #tpu.memory_space<vmem>>, vector<144x24xbf16>
    %c0_1 = arith.constant 0 : index
    %c0_2 = arith.constant 0 : index
    %1 = vector.load %arg2[%c0_1, %c0_2] : memref<24x256xbf16, #tpu.memory_space<vmem>>, vector<24x256xbf16>
    %cst = arith.constant dense<0.000000e+00> : vector<144x256xf32>
    %2 = tpu.matmul %0, %1, %cst {dimension_numbers = #tpu.dot_dimension_numbers<[1], [0], [0], [1], [0, 0, 1, 1], [], []>} : vector<144x24xbf16>, vector<24x256xbf16>, vector<144x256xf32> -> vector<144x256xf32>
    %3 = vector.extract_strided_slice %2 {offsets = [0, 0], sizes = [144, 128], strides = [1, 1]} : vector<144x256xf32> to vector<144x128xf32>
    %4 = vector.extract_strided_slice %2 {offsets = [0, 128], sizes = [144, 128], strides = [1, 1]} : vector<144x256xf32> to vector<144x128xf32>
    %5 = vector.extract_strided_slice %4 {offsets = [1, 0], sizes = [143, 128], strides = [1, 1]} : vector<144x128xf32> to vector<143x128xf32>
    %6 = vector.extract_strided_slice %4 {offsets = [0, 0], sizes = [1, 128], strides = [1, 1]} : vector<144x128xf32> to vector<1x128xf32>
    %7 = tpu.concatenate %5, %6 in 0 : vector<143x128xf32>, vector<1x128xf32> -> vector<144x128xf32>
    %8 = arith.addf %3, %7 : vector<144x128xf32>
    %c0_3 = arith.constant 0 : index
    %c0_4 = arith.constant 0 : index
    %9 = vector.load %arg3[%c0_3, %c0_4] : memref<1x128xf32, #tpu.memory_space<vmem>>, vector<1x128xf32>
    %10 = vector.broadcast %9 : vector<1x128xf32> to vector<144x128xf32>
    %11 = arith.mulf %8, %10 : vector<144x128xf32>
    %c0_5 = arith.constant 0 : index
    %c0_6 = arith.constant 0 : index
    %12 = vector.load %arg4[%c0_5, %c0_6] : memref<1x128xf32, #tpu.memory_space<vmem>>, vector<1x128xf32>
    %13 = vector.broadcast %12 : vector<1x128xf32> to vector<144x128xf32>
    %14 = arith.addf %11, %13 : vector<144x128xf32>
    %cst_7 = arith.constant 5.000000e-01 : f32
    %15 = vector.broadcast %cst_7 : f32 to vector<144x128xf32>
    %16 = arith.mulf %15, %14 : vector<144x128xf32>
    %cst_8 = arith.constant 0.707106769 : f32
    %17 = vector.broadcast %cst_8 : f32 to vector<144x128xf32>
    %18 = arith.mulf %14, %17 : vector<144x128xf32>
    %19 = math.absf %18 : vector<144x128xf32>
    %cst_9 = arith.constant 0.327591091 : f32
    %20 = vector.broadcast %cst_9 : f32 to vector<144x128xf32>
    %21 = arith.mulf %20, %19 : vector<144x128xf32>
    %cst_10 = arith.constant 1.000000e+00 : f32
    %22 = vector.broadcast %cst_10 : f32 to vector<144x128xf32>
    %23 = arith.addf %22, %21 : vector<144x128xf32>
    %cst_11 = arith.constant 1.000000e+00 : f32
    %24 = vector.broadcast %cst_11 : f32 to vector<144x128xf32>
    %25 = arith.divf %24, %23 : vector<144x128xf32>
    %cst_12 = arith.constant 1.06140542 : f32
    %26 = vector.broadcast %cst_12 : f32 to vector<144x128xf32>
    %27 = arith.mulf %26, %25 : vector<144x128xf32>
    %cst_13 = arith.constant -1.45315206 : f32
    %28 = vector.broadcast %cst_13 : f32 to vector<144x128xf32>
    %29 = arith.addf %27, %28 : vector<144x128xf32>
    %30 = arith.mulf %29, %25 : vector<144x128xf32>
    %cst_14 = arith.constant 1.42141378 : f32
    %31 = vector.broadcast %cst_14 : f32 to vector<144x128xf32>
    %32 = arith.addf %30, %31 : vector<144x128xf32>
    %33 = arith.mulf %32, %25 : vector<144x128xf32>
    %cst_15 = arith.constant -0.284496725 : f32
    %34 = vector.broadcast %cst_15 : f32 to vector<144x128xf32>
    %35 = arith.addf %33, %34 : vector<144x128xf32>
    %36 = arith.mulf %35, %25 : vector<144x128xf32>
    %cst_16 = arith.constant 0.254829586 : f32
    %37 = vector.broadcast %cst_16 : f32 to vector<144x128xf32>
    %38 = arith.addf %36, %37 : vector<144x128xf32>
    %39 = arith.mulf %38, %25 : vector<144x128xf32>
    %40 = arith.mulf %19, %19 : vector<144x128xf32>
    %cst_17 = arith.constant 0.000000e+00 : f32
    %41 = vector.broadcast %cst_17 : f32 to vector<144x128xf32>
    %42 = arith.subf %41, %40 : vector<144x128xf32>
    %43 = math.exp %42 : vector<144x128xf32>
    %44 = arith.mulf %39, %43 : vector<144x128xf32>
    %cst_18 = arith.constant 1.000000e+00 : f32
    %45 = vector.broadcast %cst_18 : f32 to vector<144x128xf32>
    %46 = arith.subf %45, %44 : vector<144x128xf32>
    %cst_19 = arith.constant 0.000000e+00 : f32
    %47 = vector.broadcast %cst_19 : f32 to vector<144x128xf32>
    %48 = arith.cmpf olt, %18, %47 : vector<144x128xf32>
    %cst_20 = arith.constant 0.000000e+00 : f32
    %49 = vector.broadcast %cst_20 : f32 to vector<144x128xf32>
    %50 = arith.subf %49, %46 : vector<144x128xf32>
    %51 = arith.select %48, %50, %46 : vector<144x128xi1>, vector<144x128xf32>
    %cst_21 = arith.constant 1.000000e+00 : f32
    %52 = vector.broadcast %cst_21 : f32 to vector<144x128xf32>
    %53 = arith.addf %52, %51 : vector<144x128xf32>
    %54 = arith.mulf %16, %53 : vector<144x128xf32>
    %c0_22 = arith.constant 0 : index
    %c0_23 = arith.constant 0 : index
    %55 = vector.load %arg5[%c0_22, %c0_23] : memref<144x128xf32, #tpu.memory_space<vmem>>, vector<144x128xf32>
    tpu.vector_store %arg5[%c0_22, %c0_23], %54 {strides = array<i32>} : memref<144x128xf32, #tpu.memory_space<vmem>>, vector<144x128xf32>,
    return
  }
  func.func @transform_0(%arg0: i32) -> (i32, i32) {
    %c0_i32 = arith.constant 0 : i32
    %c0_i32_0 = arith.constant 0 : i32
    return %arg0, %c0_i32 : i32, i32
  }
  func.func @transform_1(%arg0: i32) -> (i32, i32) {
    %c0_i32 = arith.constant 0 : i32
    %c0_i32_0 = arith.constant 0 : i32
    %c0_i32_1 = arith.constant 0 : i32
    return %c0_i32, %c0_i32_0 : i32, i32
  }
  func.func @transform_2(%arg0: i32) -> (i32, i32) {
    %c0_i32 = arith.constant 0 : i32
    %c0_i32_0 = arith.constant 0 : i32
    %c0_i32_1 = arith.constant 0 : i32
    return %c0_i32, %c0_i32_0 : i32, i32
  }
  func.func @transform_3(%arg0: i32) -> (i32, i32) {
    %c0_i32 = arith.constant 0 : i32
    %c0_i32_0 = arith.constant 0 : i32
    %c0_i32_1 = arith.constant 0 : i32
    return %c0_i32, %c0_i32_0 : i32, i32
  }
  func.func @transform_4(%arg0: i32) -> (i32, i32) {
    %c0_i32 = arith.constant 0 : i32
    %c0_i32_0 = arith.constant 0 : i32
    return %arg0, %c0_i32 : i32, i32
  }
}

module attributes {stable_mosaic.version = 11 : i64} {
  func.func @_conv_bn_act_kernel(%arg0: i32, %arg1: memref<80x48xbf16, #tpu.memory_space<vmem>>, %arg2: memref<48x256xbf16, #tpu.memory_space<vmem>>, %arg3: memref<1x128xf32, #tpu.memory_space<vmem>>, %arg4: memref<1x128xf32, #tpu.memory_space<vmem>>, %arg5: memref<80x128xf32, #tpu.memory_space<vmem>>) attributes {dimension_semantics = [#tpu.dimension_semantics<parallel>], iteration_bounds = array<i64: 1>, scalar_prefetch = 0 : i64, scratch_operands = 0 : i64, tpu.core_type = #tpu.core_type<tc>, window_params = [{transform_indices = @transform_0, window_bounds = array<i64: 80, 48>}, {pipeline_mode = #tpu.pipeline_mode<synchronous>, transform_indices = @transform_1, window_bounds = array<i64: 48, 256>}, {pipeline_mode = #tpu.pipeline_mode<synchronous>, transform_indices = @transform_2, window_bounds = array<i64: 1, 128>}, {pipeline_mode = #tpu.pipeline_mode<synchronous>, transform_indices = @transform_3, window_bounds = array<i64: 1, 128>}, {transform_indices = @transform_4, window_bounds = array<i64: 80, 128>}]} {
    %c0 = arith.constant 0 : index
    %c0_0 = arith.constant 0 : index
    %0 = vector.load %arg1[%c0, %c0_0] : memref<80x48xbf16, #tpu.memory_space<vmem>>, vector<80x48xbf16>
    %c0_1 = arith.constant 0 : index
    %c0_2 = arith.constant 0 : index
    %1 = vector.load %arg2[%c0_1, %c0_2] : memref<48x256xbf16, #tpu.memory_space<vmem>>, vector<48x256xbf16>
    %cst = arith.constant dense<0.000000e+00> : vector<80x256xf32>
    %2 = tpu.matmul %0, %1, %cst {dimension_numbers = #tpu.dot_dimension_numbers<[1], [0], [0], [1], [0, 0, 1, 1], [], []>} : vector<80x48xbf16>, vector<48x256xbf16>, vector<80x256xf32> -> vector<80x256xf32>
    %3 = vector.extract_strided_slice %2 {offsets = [0, 0], sizes = [80, 128], strides = [1, 1]} : vector<80x256xf32> to vector<80x128xf32>
    %4 = vector.extract_strided_slice %2 {offsets = [0, 128], sizes = [80, 128], strides = [1, 1]} : vector<80x256xf32> to vector<80x128xf32>
    %5 = vector.extract_strided_slice %4 {offsets = [1, 0], sizes = [79, 128], strides = [1, 1]} : vector<80x128xf32> to vector<79x128xf32>
    %6 = vector.extract_strided_slice %4 {offsets = [0, 0], sizes = [1, 128], strides = [1, 1]} : vector<80x128xf32> to vector<1x128xf32>
    %7 = tpu.concatenate %5, %6 in 0 : vector<79x128xf32>, vector<1x128xf32> -> vector<80x128xf32>
    %8 = arith.addf %3, %7 : vector<80x128xf32>
    %c0_3 = arith.constant 0 : index
    %c0_4 = arith.constant 0 : index
    %9 = vector.load %arg3[%c0_3, %c0_4] : memref<1x128xf32, #tpu.memory_space<vmem>>, vector<1x128xf32>
    %10 = vector.broadcast %9 : vector<1x128xf32> to vector<80x128xf32>
    %11 = arith.mulf %8, %10 : vector<80x128xf32>
    %c0_5 = arith.constant 0 : index
    %c0_6 = arith.constant 0 : index
    %12 = vector.load %arg4[%c0_5, %c0_6] : memref<1x128xf32, #tpu.memory_space<vmem>>, vector<1x128xf32>
    %13 = vector.broadcast %12 : vector<1x128xf32> to vector<80x128xf32>
    %14 = arith.addf %11, %13 : vector<80x128xf32>
    %c0_7 = arith.constant 0 : index
    %c0_8 = arith.constant 0 : index
    %15 = vector.load %arg5[%c0_7, %c0_8] : memref<80x128xf32, #tpu.memory_space<vmem>>, vector<80x128xf32>
    tpu.vector_store %arg5[%c0_7, %c0_8], %14 {strides = array<i32>} : memref<80x128xf32, #tpu.memory_space<vmem>>, vector<80x128xf32>,
    return
  }
  func.func @transform_0(%arg0: i32) -> (i32, i32) {
    %c0_i32 = arith.constant 0 : i32
    %c0_i32_0 = arith.constant 0 : i32
    return %arg0, %c0_i32 : i32, i32
  }
  func.func @transform_1(%arg0: i32) -> (i32, i32) {
    %c0_i32 = arith.constant 0 : i32
    %c0_i32_0 = arith.constant 0 : i32
    %c0_i32_1 = arith.constant 0 : i32
    return %c0_i32, %c0_i32_0 : i32, i32
  }
  func.func @transform_2(%arg0: i32) -> (i32, i32) {
    %c0_i32 = arith.constant 0 : i32
    %c0_i32_0 = arith.constant 0 : i32
    %c0_i32_1 = arith.constant 0 : i32
    return %c0_i32, %c0_i32_0 : i32, i32
  }
  func.func @transform_3(%arg0: i32) -> (i32, i32) {
    %c0_i32 = arith.constant 0 : i32
    %c0_i32_0 = arith.constant 0 : i32
    %c0_i32_1 = arith.constant 0 : i32
    return %c0_i32, %c0_i32_0 : i32, i32
  }
  func.func @transform_4(%arg0: i32) -> (i32, i32) {
    %c0_i32 = arith.constant 0 : i32
    %c0_i32_0 = arith.constant 0 : i32
    return %arg0, %c0_i32 : i32, i32
  }
}

</mosaic_0001>

<bundles_post_ra>
// kernel: _lambda_.3
= control target key start
LH: loop header
LB: loop body
LE: loop exit
PB: predicated region body
PF: predicated region fallthrough
CT: control target
= control target key end

     0   :  { %v327_v1 = vmov 0   ;;  %vm89_vm0 = vcmask 392192   ;;  %vm198_vm1 = vcmask 1046528   ;;  %s463_s1 = inlined_call_operand.vmem [shape: bf16[48,256], index: 1, kind: input, shape index: {}]   ;;  %s464_s0 = inlined_call_operand.vmem [shape: bf16[80,48], index: 0, kind: input, shape index: {}]   ;;  %s465_s2 = inlined_call_operand.vmem [shape: f32[1,128], index: 2, kind: input, shape index: {}]   ;;  %s466_s3 = inlined_call_operand.vmem [shape: f32[1,128], index: 3, kind: input, shape index: {}]   ;;  %s467_s4 = inlined_call_operand.vmem [shape: f32[80,128], index: 4, kind: output, shape index: {}]  }
   0x1   :  { %v313_v0 = vld [vmem:[%s463_s1 + $0x4] ss:$8 sps:$4 sm:$0xff]   ;;  %137 = vmatprep.mubr.bf16.mxu0 %v327_v1  ;;  %167 = vmatprep.mubr.bf16.mxu1 %v327_v1  ;;  %v315_v2 = vld [vmem:[%s463_s1] ss:$8 sps:$4 sm:$0xff]   ;;  %v316_v3 = vld [vmem:[%s463_s1 + $0x14] ss:$8 sps:$4 sm:$0xff]  }
   0x2   :  { %105 = vmatprep.subr.bf16.mxu0 %v313_v0  ;;  %306 = vmatprep.subr.bf16.mxu1 %v313_v0  ;;  %v318_v4 = vld [vmem:[%s463_s1 + $0x10] ss:$8 sps:$4 sm:$0xff]   ;;  %v319_v5 = vld [vmem:[%s463_s1 + $0x24] ss:$8 sps:$4 sm:$0xff]   ;;  %v321_v6 = vld [vmem:[%s463_s1 + $0x20] ss:$8 sps:$4 sm:$0xff]  }
   0x3   :  { %106 = vmatpush1.bf16.msra.mxu0 %v315_v2  ;;  %309 = vmatpush1.bf16.msra.mxu1 %v315_v2  ;;  %v322_v7 = vld [vmem:[%s464_s0] sm:$0xff]   ;;  %v323_v8 = vld [vmem:[%s464_s0 + $0x18] sm:$0xff]   ;;  %v324_v9 = vld [vmem:[%s464_s0 + $0x8] sm:$0xff]  }
   0x4   :  { %107 = vmatprep.subr.bf16.mxu0 %v316_v3  ;;  %307 = vmatprep.subr.bf16.mxu1 %v316_v3  ;;  %v325_v10 = vld [vmem:[%s464_s0 + $0x20] sm:$0xff]   ;;  %v326_v11 = vld [vmem:[%s464_s0 + $0x10] sm:$0xff]  }
   0x5   :  { %v393_v25 = vld [vmem:[%s465_s2] ss:$0 sm:$0xff] }
   0x6   :  { %v401_v29 = vld [vmem:[%s466_s3] ss:$0 sm:$0xff] }
   0x7   :  { %108 = vmatpush1.bf16.msra.mxu0 %v318_v4  ;;  %310 = vmatpush1.bf16.msra.mxu1 %v318_v4 }
   0x8   :  { %109 = vmatprep.subr.bf16.mxu0 %v319_v5  ;;  %308 = vmatprep.subr.bf16.mxu1 %v319_v5 }
   0xb   :  { %110 = vmatpush1.bf16.msra.mxu0 %v321_v6  ;;  %311 = vmatpush1.bf16.msra.mxu1 %v321_v6 }
   0xe   :  { %299 = vmatmul.mubr.msk.bf16.vlgmr.msra.gmra.mrb[0].mxu0 %vm89_vm0, %v322_v7  ;;  %302 = vmatmul.mubr.msk.bf16.vlgmr.msra.gmra.mrb[0].mxu1 %vm89_vm0, %v323_v8 }
   0xf   :  { %147 = vmatprep.mubr.bf16.mxu0 %v327_v1  ;;  %177 = vmatprep.mubr.bf16.mxu1 %v327_v1 }
  0x16   :  { %300 = vmatmul.mubr.msk.bf16.gmra.mrb[4].mxu0 %vm89_vm0, %v324_v9  ;;  %303 = vmatmul.mubr.msk.bf16.gmra.mrb[4].mxu1 %vm89_vm0, %v325_v10 }
  0x17   :  { %157 = vmatprep.mubr.bf16.mxu0 %v327_v1 }
  0x1e   :  { %301 = vmatmul.mubr.msk.bf16.gmra.mrb[8].mxu0 %vm89_vm0, %v326_v11 }
  0xe1   :  { %v139_v12 = vpop.f32.mrb[0].mxu0  ;;  %v169_v13 = vpop.f32.mrb[0].mxu1 }
  0xe2   :  { %v141_v14 = vpop.f32.mrb[1].mxu0  ;;  %v386_v15 = vpop.f32.mrb[1].mxu1 }
  0xe3   :  { %v143_v16 = vpop.f32.mrb[2].mxu0  ;;  %v210_v17 = vrot.slane %v386_v15, 1  ;;  %v173_v18 = vpop.f32.mrb[2].mxu1  ;;  %v199_v21 = vrot.slane %v141_v14, 1 }
  0xe4   :  { %v145_v19 = vpop.f32.mrb[3].mxu0  ;;  %v175_v20 = vpop.f32.mrb[3].mxu1 }
  0xe5   :  { %v200_v22 = vrot.slane %v145_v19, 1  ;;  %v212_v23 = vrot.slane %v175_v20, 1 }
  0xe7   :  { %v201_v24 = vsel %vm198_vm1, %v199_v21, %v200_v22  ;;  %v213_v26 = vsel %vm198_vm1, %v210_v17, %v212_v23 }
  0xe8   :  { %v230_v27 = vadd.f32 %v201_v24, %v139_v12  ;;  %v236_v28 = vadd.f32 %v213_v26, %v169_v13 }
  0xe9   :  { %v149_v30 = vpop.f32.mrb[4].mxu0  ;;  %v179_v31 = vpop.f32.mrb[4].mxu1 }
  0xea   :  { %v247_v32 = vmul.f32 %v393_v25, %v230_v27  ;;  %v253_v33 = vmul.f32 %v393_v25, %v236_v28  ;;  %v151_v34 = vpop.f32.mrb[5].mxu0  ;;  %v181_v35 = vpop.f32.mrb[5].mxu1 }
  0xeb   :  { %v202_v36 = vrot.slane %v151_v34, 1  ;;  %v214_v37 = vrot.slane %v181_v35, 1  ;;  %v153_v38 = vpop.f32.mrb[6].mxu0  ;;  %v183_v39 = vpop.f32.mrb[6].mxu1 }
  0xec   :  { %v264_v40 = vadd.f32 %v401_v29, %v247_v32  ;;  %v270_v41 = vadd.f32 %v401_v29, %v253_v33  ;;  %v155_v42 = vpop.f32.mrb[7].mxu0  ;;  %v185_v43 = vpop.f32.mrb[7].mxu1 }
  0xed   :  { %v203_v44 = vsel %vm198_vm1, %v200_v22, %v202_v36  ;;  %v215_v45 = vsel %vm198_vm1, %v212_v23, %v214_v37  ;;  %v204_v46 = vrot.slane %v155_v42, 1  ;;  %v216_v47 = vrot.slane %v185_v43, 1 }
  0xee   :  { %274 = vst [vmem:[%s467_s4] sm:$0xff] %v264_v40  ;;  %280 = vst [vmem:[%s467_s4 + $0x30] sm:$0xff] %v270_v41  ;;  %v231_v48 = vadd.f32 %v203_v44, %v143_v16  ;;  %v237_v49 = vadd.f32 %v215_v45, %v173_v18 }
  0xef   :  { %v205_v50 = vsel %vm198_vm1, %v202_v36, %v204_v46  ;;  %v217_v51 = vsel %vm198_vm1, %v214_v37, %v216_v47  ;;  %v229_v52 = vsel %vm198_vm1, %v216_v47, %v199_v21 }
  0xf0   :  { %v248_v53 = vmul.f32 %v393_v25, %v231_v48  ;;  %v254_v54 = vmul.f32 %v393_v25, %v237_v49  ;;  %v232_v55 = vadd.f32 %v205_v50, %v149_v30  ;;  %v238_v56 = vadd.f32 %v217_v51, %v179_v31 }
  0xf1   :  { %v239_v57 = vadd.f32 %v229_v52, %v183_v39  ;;  %v159_v58 = vpop.f32.mrb[8].mxu0 }
  0xf2   :  { %v265_v59 = vadd.f32 %v401_v29, %v248_v53  ;;  %v271_v60 = vadd.f32 %v401_v29, %v254_v54  ;;  %v249_v61 = vmul.f32 %v393_v25, %v232_v55  ;;  %v255_v62 = vmul.f32 %v393_v25, %v238_v56  ;;  %v161_v63 = vpop.f32.mrb[9].mxu0 }
  0xf3   :  { %v256_v0 = vmul.f32 %v393_v25, %v239_v57  ;;  %v206_v1 = vrot.slane %v161_v63, 1  ;;  %v163_v2 = vpop.f32.mrb[10].mxu0 }
  0xf4   :  { %275 = vst [vmem:[%s467_s4 + $0x8] sm:$0xff] %v265_v59  ;;  %281 = vst [vmem:[%s467_s4 + $0x38] sm:$0xff] %v271_v60  ;;  %v266_v3 = vadd.f32 %v401_v29, %v249_v61  ;;  %v272_v4 = vadd.f32 %v401_v29, %v255_v62  ;;  %v165_v5 = vpop.f32.mrb[11].mxu0 }
  0xf5   :  { %v273_v6 = vadd.f32 %v401_v29, %v256_v0  ;;  %v207_v7 = vsel %vm198_vm1, %v204_v46, %v206_v1  ;;  %v208_v8 = vrot.slane %v165_v5, 1 }
  0xf6   :  { %276 = vst [vmem:[%s467_s4 + $0x10] sm:$0xff] %v266_v3  ;;  %282 = vst [vmem:[%s467_s4 + $0x40] sm:$0xff] %v272_v4  ;;  %v233_v9 = vadd.f32 %v207_v7, %v153_v38 }
  0xf7   :  { %283 = vst [vmem:[%s467_s4 + $0x48] sm:$0xff] %v273_v6  ;;  %v209_v10 = vsel %vm198_vm1, %v206_v1, %v208_v8  ;;  %v211_v11 = vsel %vm198_vm1, %v208_v8, %v210_v17 }
  0xf8   :  { %v250_v12 = vmul.f32 %v393_v25, %v233_v9  ;;  %v234_v13 = vadd.f32 %v209_v10, %v159_v58  ;;  %v235_v14 = vadd.f32 %v211_v11, %v163_v2 }
  0xfa   :  { %v267_v16 = vadd.f32 %v401_v29, %v250_v12  ;;  %v251_v18 = vmul.f32 %v393_v25, %v234_v13  ;;  %v252_v19 = vmul.f32 %v393_v25, %v235_v14 }
  0xfc   :  { %277 = vst [vmem:[%s467_s4 + $0x18] sm:$0xff] %v267_v16  ;;  %v268_v20 = vadd.f32 %v401_v29, %v251_v18  ;;  %v269_v15 = vadd.f32 %v401_v29, %v252_v19 }
  0xfe   :  { %278 = vst [vmem:[%s467_s4 + $0x20] sm:$0xff] %v268_v20  ;;  %279 = vst [vmem:[%s467_s4 + $0x28] sm:$0xff] %v269_v15 }

// kernel: _lambda_.2
= control target key start
LH: loop header
LB: loop body
LE: loop exit
PB: predicated region body
PF: predicated region fallthrough
CT: control target
= control target key end

     0   :  { %v1023_v1 = vmov 0   ;;  %vm127_vm0 = vcmask 1043456   ;;  %vm99_vm1 = vcmask 195584   ;;  %vm275_vm2 = vcmask 1046528   ;;  %s1601_s1 = inlined_call_operand.vmem [shape: bf16[24,256], index: 1, kind: input, shape index: {}]   ;;  %s1602_s0 = inlined_call_operand.vmem [shape: bf16[144,24], index: 0, kind: input, shape index: {}]   ;;  %s1603_s2 = inlined_call_operand.vmem [shape: f32[1,128], index: 2, kind: input, shape index: {}]   ;;  %s1604_s3 = inlined_call_operand.vmem [shape: f32[1,128], index: 3, kind: input, shape index: {}]   ;;  %s1605_s4 = inlined_call_operand.vmem [shape: f32[144,128], index: 4, kind: output, shape index: {}]  }
   0x1   :  { %v38_v0 = vld [vmem:[%s1601_s1 + $0x10] sm:$0xff]  ;;  %166 = vmatprep.mubr.bf16.mxu0 %v1023_v1  ;;  %216 = vmatprep.mubr.bf16.mxu1 %v1023_v1  ;;  %v937_v2 = vld [vmem:[%s1601_s1 + $0x4] ss:$8 sps:$4 sm:$0xff]   ;;  %v939_v3 = vld [vmem:[%s1601_s1] ss:$8 sps:$4 sm:$0xff]  }
   0x2   :  { %v919_v4 = vcombine.high %v38_v0, %v38_v0  ;;  %v918_v5 = vcombine.low %v38_v0, %v38_v0  ;;  %134 = vmatprep.subr.bf16.mxu0 %v937_v2  ;;  %932 = vmatprep.subr.bf16.mxu1 %v937_v2  ;;  %v942_v7 = vld [vmem:[%s1602_s0] sm:$0xff]   ;;  %v943_v8 = vld [vmem:[%s1602_s0 + $0x28] sm:$0xff]   ;;  %v945_v10 = vld [vmem:[%s1602_s0 + $0x30] sm:$0xff]  }
   0x3   :  { %135 = vmatpush1.bf16.msra.mxu0 %v939_v3  ;;  %934 = vmatpush1.bf16.msra.mxu1 %v939_v3  ;;  %v944_v9 = vld [vmem:[%s1602_s0 + $0x8] sm:$0xff]   ;;  %v946_v11 = vld [vmem:[%s1602_s0 + $0x10] sm:$0xff]   ;;  %v947_v12 = vld [vmem:[%s1602_s0 + $0x38] sm:$0xff]  }
   0x4   :  { %920 = vmatprep.subr.msk.bf16.mxu0 %vm127_vm0, %v919_v4  ;;  %933 = vmatprep.subr.msk.bf16.mxu1 %vm127_vm0, %v919_v4  ;;  %v129_v6 = vsel %vm127_vm0, %v918_v5, 0  ;;  %v948_v13 = vld [vmem:[%s1602_s0 + $0x18] sm:$0xff]   ;;  %v949_v14 = vld [vmem:[%s1602_s0 + $0x40] sm:$0xff]  }
   0x5   :  { %v950_v15 = vld [vmem:[%s1602_s0 + $0x20] sm:$0xff]  }
   0x6   :  { %v1106_v29 = vld [vmem:[%s1603_s2] ss:$0 sm:$0xff] }
   0x7   :  { %137 = vmatpush1.bf16.msra.mxu0 %v129_v6  ;;  %935 = vmatpush1.bf16.msra.mxu1 %v129_v6  ;;  %v1114_v33 = vld [vmem:[%s1604_s3] ss:$0 sm:$0xff] }
   0xa   :  { %921 = vmatmul.mubr.msk.bf16.vlgmr.msra.gmra.mrb[0].mxu0 %vm99_vm1, %v942_v7  ;;  %926 = vmatmul.mubr.msk.bf16.vlgmr.msra.gmra.mrb[0].mxu1 %vm99_vm1, %v943_v8 }
   0xb   :  { %176 = vmatprep.mubr.bf16.mxu0 %v1023_v1  ;;  %226 = vmatprep.mubr.bf16.mxu1 %v1023_v1 }
  0x12   :  { %922 = vmatmul.mubr.msk.bf16.gmra.mrb[4].mxu0 %vm99_vm1, %v944_v9  ;;  %927 = vmatmul.mubr.msk.bf16.gmra.mrb[4].mxu1 %vm99_vm1, %v945_v10 }
  0x13   :  { %186 = vmatprep.mubr.bf16.mxu0 %v1023_v1  ;;  %236 = vmatprep.mubr.bf16.mxu1 %v1023_v1 }
  0x1a   :  { %923 = vmatmul.mubr.msk.bf16.gmra.mrb[8].mxu0 %vm99_vm1, %v946_v11  ;;  %928 = vmatmul.mubr.msk.bf16.gmra.mrb[8].mxu1 %vm99_vm1, %v947_v12 }
  0x1b   :  { %196 = vmatprep.mubr.bf16.mxu0 %v1023_v1  ;;  %246 = vmatprep.mubr.bf16.mxu1 %v1023_v1 }
  0x22   :  { %924 = vmatmul.mubr.msk.bf16.gmra.mrb[12].mxu0 %vm99_vm1, %v948_v13  ;;  %929 = vmatmul.mubr.msk.bf16.gmra.mrb[12].mxu1 %vm99_vm1, %v949_v14 }
  0x23   :  { %206 = vmatprep.mubr.bf16.mxu0 %v1023_v1 }
  0x2a   :  { %925 = vmatmul.mubr.msk.bf16.gmra.mrb[16].mxu0 %vm99_vm1, %v950_v15 }
  0xdd   :  { %v168_v16 = vpop.f32.mrb[0].mxu0  ;;  %v218_v17 = vpop.f32.mrb[0].mxu1 }
  0xde   :  { %v1094_v18 = vpop.f32.mrb[1].mxu0  ;;  %v1096_v19 = vpop.f32.mrb[1].mxu1 }
  0xdf   :  { %1612 = vst [vmem:[#allocation2_spill] sm:$0xff] %v1096_v19  ;;  %v1606_v20 = vrot.slane %v1096_v19, 1  ;;  %v172_v21 = vpop.f32.mrb[2].mxu0  ;;  %v222_v22 = vpop.f32.mrb[2].mxu1  ;;  %v1607_v25 = vrot.slane %v1094_v18, 1 }
  0xe0   :  { %v174_v23 = vpop.f32.mrb[3].mxu0  ;;  %v224_v24 = vpop.f32.mrb[3].mxu1 }
  0xe1   :  { %v277_v26 = vrot.slane %v174_v23, 1  ;;  %v297_v27 = vrot.slane %v224_v24, 1 }
  0xe3   :  { %v278_v28 = vsel %vm275_vm2, %v1607_v25, %v277_v26  ;;  %v298_v30 = vsel %vm275_vm2, %v1606_v20, %v297_v27 }
  0xe4   :  { %v331_v31 = vadd.f32 %v278_v28, %v168_v16  ;;  %v341_v32 = vadd.f32 %v298_v30, %v218_v17 }
  0xe5   :  { %v178_v34 = vpop.f32.mrb[4].mxu0  ;;  %v228_v35 = vpop.f32.mrb[4].mxu1 }
  0xe6   :  { %v356_v36 = vmul.f32 %v1106_v29, %v331_v31  ;;  %v366_v37 = vmul.f32 %v1106_v29, %v341_v32  ;;  %v180_v38 = vpop.f32.mrb[5].mxu0  ;;  %v230_v39 = vpop.f32.mrb[5].mxu1 }
  0xe7   :  { %v279_v40 = vrot.slane %v180_v38, 1  ;;  %v299_v41 = vrot.slane %v230_v39, 1  ;;  %v1118_v42 = vpop.f32.mrb[6].mxu0  ;;  %v1120_v43 = vpop.f32.mrb[6].mxu1 }
  0xe8   :  { %v1123_v44 = vadd.f32 %v1114_v33, %v356_v36  ;;  %v1126_v45 = vadd.f32 %v1114_v33, %v366_v37  ;;  %v1128_v46 = vpop.f32.mrb[7].mxu0  ;;  %v1130_v47 = vpop.f32.mrb[7].mxu1 }
  0xe9   :  { %v280_v48 = vsel %vm275_vm2, %v277_v26, %v279_v40  ;;  %v300_v49 = vsel %vm275_vm2, %v297_v27, %v299_v41  ;;  %v281_v50 = vrot.slane %v1128_v46, 1  ;;  %v301_v51 = vrot.slane %v1130_v47, 1 }
  0xea   :  { %v1137_v52 = vmul.f32 0.70710677, %v1123_v44  ;;  %v1140_v53 = vmul.f32 0.70710677, %v1126_v45  ;;  %v332_v54 = vadd.f32 %v280_v48, %v172_v21  ;;  %v342_v55 = vadd.f32 %v300_v49, %v222_v22 }
  0xeb   :  { %v282_v56 = vsel %vm275_vm2, %v279_v40, %v281_v50  ;;  %v302_v57 = vsel %vm275_vm2, %v299_v41, %v301_v51 }
  0xec   :  { %v435_v58 = vand.u32 2147483647, %v1137_v52  ;;  %v445_v59 = vand.u32 2147483647, %v1140_v53  ;;  %v357_v60 = vmul.f32 %v1106_v29, %v332_v54  ;;  %v367_v61 = vmul.f32 %v1106_v29, %v342_v55 }
  0xed   :  { %v333_v62 = vadd.f32 %v282_v56, %v178_v34  ;;  %v343_v63 = vadd.f32 %v302_v57, %v228_v35  ;;  %v1152_v0 = vpop.f32.mrb[8].mxu0  ;;  %v1154_v1 = vpop.f32.mrb[8].mxu1  ;;  %vm795_vm3 = vcmp.lt.f32.partialorder %v1137_v52, 0.0  ;;  %vm805_vm4 = vcmp.lt.f32.partialorder %v1140_v53, 0.0 }
  0xee   :  { %v453_v2 = vmul.f32 0.3275911, %v435_v58  ;;  %v687_v3 = vmul.f32 %v435_v58, %v435_v58  ;;  %v463_v4 = vmul.f32 0.3275911, %v445_v59  ;;  %v1156_v5 = vpop.f32.mrb[9].mxu0  ;;  %v1158_v6 = vpop.f32.mrb[9].mxu1  ;;  %v382_v7 = vadd.f32 %v1114_v33, %v357_v60 }
  0xef   :  { %v392_v8 = vadd.f32 %v1114_v33, %v367_v61  ;;  %v358_v9 = vmul.f32 %v1106_v29, %v333_v62  ;;  %v1163_v10 = vpop.f32.mrb[10].mxu0  ;;  %v1165_v11 = vpop.f32.mrb[10].mxu1  ;;  %v697_v14 = vmul.f32 %v445_v59, %v445_v59  ;;  %v368_v24 = vmul.f32 %v1106_v29, %v343_v63 }
  0xf0   :  { %v471_v12 = vadd.f32 1.0, %v453_v2  ;;  %v481_v13 = vadd.f32 1.0, %v463_v4  ;;  %v1167_v15 = vpop.f32.mrb[11].mxu0  ;;  %v1169_v16 = vpop.f32.mrb[11].mxu1  ;;  %v1171_v17 = vmul.f32 0.70710677, %v382_v7 }
  0xf1   :  { %v1173_v21 = vmul.f32 0.70710677, %v392_v8  ;;  %v705_v22 = vsub.f32 0.0, %v687_v3  ;;  %v1176_v23 = vadd.f32 %v1114_v33, %v358_v9  ;;  %v715_v28 = vsub.f32 0.0, %v697_v14 }
  0xf2   :  { %951 = vrcp.f32 %v471_v12  ;;  %v436_v26 = vand.u32 2147483647, %v1171_v17  ;;  %v1190_v39 = vadd.f32 %v1114_v33, %v368_v24  ;;  %v283_v55 = vrot.slane %v1156_v5, 1 }
  0xf3   :  { %953 = vrcp.f32 %v481_v13  ;;  %v446_v27 = vand.u32 2147483647, %v1173_v21  ;;  %v1182_v30 = vmul.f32 0.70710677, %v1176_v23  ;;  %v723_v37 = vmul.f32 1.442695, %v705_v22 }
  0xf4   :  { %v454_v31 = vmul.f32 0.3275911, %v436_v26  ;;  %v688_v32 = vmul.f32 %v436_v26, %v436_v26  ;;  %v1202_v58 = vmul.f32 0.5, %v1123_v44  ;;  %v1209_v63 = vmul.f32 0.5, %v1126_v45 }
  0xf5   :  { %v464_v34 = vmul.f32 0.3275911, %v446_v27  ;;  %v1184_v35 = vpop.f32.mrb[12].mxu0  ;;  %v1186_v36 = vpop.f32.mrb[12].mxu1  ;;  %v437_v38 = vand.u32 2147483647, %v1182_v30  ;;  %v698_v54 = vmul.f32 %v446_v27, %v446_v27  ;;  %v284_v3 = vsel %vm275_vm2, %v281_v50, %v283_v55 }
  0xf6   :  { %v1192_v40 = vpop.f32.mrb[13].mxu0  ;;  %v1194_v41 = vpop.f32.mrb[13].mxu1  ;;  %v472_v48 = vadd.f32 1.0, %v454_v31  ;;  %v706_v59 = vsub.f32 0.0, %v688_v32  ;;  %v1212_v2 = vmul.f32 0.70710677, %v1190_v39  ;;  %v334_v45 = vadd.f32 %v284_v3, %v1118_v42 }
  0xf7   :  { %v482_v49 = vadd.f32 1.0, %v464_v34  ;;  %v1197_v56 = vpop.f32.mrb[14].mxu0  ;;  %v1199_v57 = vpop.f32.mrb[14].mxu1  ;;  %v455_v60 = vmul.f32 0.3275911, %v437_v38  ;;  %v1217_v4 = vmul.f32 0.5, %v382_v7  ;;  %v689_v24 = vmul.f32 %v437_v38, %v437_v38 }
  0xf8   :  { %1613 = vst [vmem:[#allocation3_spill] sm:$0xff] %v1197_v56  ;;  %1614 = vst [vmem:[#allocation4_spill] sm:$0xff] %v1199_v57  ;;  %v1204_v61 = vpop.f32.mrb[15].mxu0  ;;  %v1206_v62 = vpop.f32.mrb[15].mxu1  ;;  %955 = vrcp.f32 %v472_v48  ;;  %v1219_v44 = vmul.f32 0.5, %v392_v8  ;;  %v716_v12 = vsub.f32 0.0, %v698_v54  ;;  %v359_v31 = vmul.f32 %v1106_v29, %v334_v45 }
  0xf9   :  { %957 = vrcp.f32 %v482_v49  ;;  %v473_v5 = vadd.f32 1.0, %v455_v60  ;;  %v743_v9 = vmul.f32 1.442695, %v715_v28  ;;  %v447_v13 = vand.u32 2147483647, %v1212_v2 }
  0xfa   :  { %959 = vpow2.f32 %v723_v37  ;;  %v725_v22 = vmul.f32 1.442695, %v706_v59  ;;  %v303_v46 = vrot.slane %v1158_v6, 1  ;;  %v1609_v50 = vrot.slane %v1167_v15, 1 }
  0xfb   :  { %961 = vrcp.f32 %v473_v5  ;;  %v465_v26 = vmul.f32 0.3275911, %v447_v13  ;;  %v699_v42 = vmul.f32 %v447_v13, %v447_v13  ;;  %v745_v37 = vmul.f32 1.442695, %v716_v12 }
  0xfc   :  { %v1223_v14 = vpop.eup %951  ;;  %v304_v6 = vsel %vm275_vm2, %v301_v51, %v303_v46  ;;  %v1243_v59 = vadd.f32 %v1114_v33, %v359_v31  ;;  %v286_v60 = vsel %vm275_vm2, %v283_v55, %v1609_v50  ;;  %v1608_v47 = vrot.slane %v1169_v16, 1 }
  0xfd   :  { %v1227_v7 = vpop.eup %953  ;;  %v525_v8 = vmul.f32 1.0614054, %v1223_v14  ;;  %v1230_v27 = vpop.f32.mrb[16].mxu0  ;;  %v483_v48 = vadd.f32 1.0, %v465_v26  ;;  %v344_v49 = vadd.f32 %v304_v6, %v1120_v43  ;;  %v707_v5 = vsub.f32 0.0, %v689_v24 }
  0xfe   :  { %1615 = vst [vmem:[#allocation5_spill] sm:$0xff] %v1230_v27  ;;  %v535_v28 = vmul.f32 1.0614054, %v1227_v7  ;;  %v1237_v32 = vpop.f32.mrb[17].mxu0  ;;  %v717_v13 = vsub.f32 0.0, %v699_v42  ;;  %v1266_v24 = vsel %vm275_vm2, %v303_v46, %v1608_v47  ;;  %vm796_vm5 = vcmp.lt.f32.partialorder %v1171_v17, 0.0 }
  0xff   :  { %1616 = vst [vmem:[#allocation6_spill] sm:$0xff] %v1237_v32  ;;  %v543_v34 = vadd.f32 -1.4531521, %v525_v8  ;;  %v1240_v38 = vpop.f32.mrb[18].mxu0  ;;  %963 = vrcp.f32 %v483_v48  ;;  %v369_v43 = vmul.f32 %v1106_v29, %v344_v49  ;;  %v1255_v45 = vmul.f32 0.70710677, %v1243_v59 }
 0x100   :  { %1617 = vst [vmem:[#allocation7_spill] sm:$0xff] %v1240_v38  ;;  %v553_v54 = vadd.f32 -1.4531521, %v535_v28  ;;  %v1249_v51 = vpop.f32.mrb[19].mxu0  ;;  %v335_v8 = vadd.f32 %v286_v60, %v1152_v0  ;;  %965 = vpow2.f32 %v743_v9  ;;  %v727_v48 = vmul.f32 1.442695, %v707_v5 }
 0x101   :  { %1618 = vst [vmem:[#allocation8_spill] sm:$0xff] %v1249_v51  ;;  %v561_v3 = vmul.f32 %v1223_v14, %v543_v34  ;;  %v1261_v28 = vadd.f32 %v1114_v33, %v369_v43  ;;  %967 = vpow2.f32 %v725_v22  ;;  %v438_v0 = vand.u32 2147483647, %v1255_v45 }
 0x102   :  { %v571_v12 = vmul.f32 %v1227_v7, %v553_v54  ;;  %v1258_v26 = vpop.eup %955  ;;  %969 = vpow2.f32 %v745_v37  ;;  %v747_v46 = vmul.f32 1.442695, %v717_v13  ;;  %vm806_vm6 = vcmp.lt.f32.partialorder %v1173_v21, 0.0 }
 0x103   :  { %v579_v55 = vadd.f32 1.4214138, %v561_v3  ;;  %v1268_v31 = vpop.eup %957  ;;  %v526_v6 = vmul.f32 1.0614054, %v1258_v26  ;;  %v456_v3 = vmul.f32 0.3275911, %v438_v0  ;;  %v690_v25 = vmul.f32 %v438_v0, %v438_v0 }
 0x104   :  { %v589_v42 = vadd.f32 1.4214138, %v571_v12  ;;  %v536_v9 = vmul.f32 1.0614054, %v1268_v31  ;;  %v960_v49 = vpop.eup %959  ;;  %v1278_v22 = vmul.f32 0.70710677, %v1261_v28  ;;  %971 = vpow2.f32 %v727_v48 }
 0x105   :  { %v597_v34 = vmul.f32 %v1223_v14, %v579_v55  ;;  %v544_v60 = vadd.f32 -1.4531521, %v526_v6  ;;  %v1275_v43 = vpop.eup %961  ;;  %v474_v5 = vadd.f32 1.0, %v456_v3  ;;  %vm797_vm7 = vcmp.lt.f32.partialorder %v1182_v30, 0.0 }
 0x106   :  { %v607_v54 = vmul.f32 %v1227_v7, %v589_v42  ;;  %v554_v20 = vadd.f32 -1.4531521, %v536_v9  ;;  %v527_v37 = vmul.f32 1.0614054, %v1275_v43  ;;  %v448_v13 = vand.u32 2147483647, %v1278_v22 }
 0x107   :  { %v615_v12 = vadd.f32 -0.28449672, %v597_v34  ;;  %v562_v55 = vmul.f32 %v1258_v26, %v544_v60  ;;  %973 = vrcp.f32 %v474_v5  ;;  %v708_v60 = vsub.f32 0.0, %v690_v25 }
 0x108   :  { %v625_v47 = vadd.f32 -0.28449672, %v607_v54  ;;  %v572_v42 = vmul.f32 %v1268_v31, %v554_v20  ;;  %v545_v0 = vadd.f32 -1.4531521, %v527_v37  ;;  %975 = vpow2.f32 %v747_v46 }
 0x109   :  { %v633_v50 = vmul.f32 %v1223_v14, %v615_v12  ;;  %v580_v34 = vadd.f32 1.4214138, %v562_v55  ;;  %v1286_v9 = vpop.eup %963  ;;  %v360_v46 = vmul.f32 %v1106_v29, %v335_v8  ;;  %v729_v51 = vmul.f32 1.442695, %v708_v60 }
 0x10a   :  { %v643_v6 = vmul.f32 %v1227_v7, %v625_v47  ;;  %v590_v38 = vadd.f32 1.4214138, %v572_v42  ;;  %v563_v20 = vmul.f32 %v1275_v43, %v545_v0  ;;  %v537_v48 = vmul.f32 1.0614054, %v1286_v9  ;;  %v966_v27 = vpop.eup %965 }
 0x10b   :  { %v651_v54 = vadd.f32 0.2548296, %v633_v50  ;;  %v598_v12 = vmul.f32 %v1258_v26, %v580_v34  ;;  %v466_v50 = vmul.f32 0.3275911, %v448_v13  ;;  %v968_v25 = vpop.eup %967  ;;  %v1305_v60 = vadd.f32 %v1114_v33, %v360_v46 }
 0x10c   :  { %v661_v3 = vadd.f32 0.2548296, %v643_v6  ;;  %v608_v55 = vmul.f32 %v1268_v31, %v590_v38  ;;  %v581_v42 = vadd.f32 1.4214138, %v563_v20  ;;  %v555_v6 = vadd.f32 -1.4531521, %v537_v48  ;;  %v970_v34 = vpop.eup %969 }
 0x10d   :  { %v669_v47 = vmul.f32 %v1223_v14, %v651_v54  ;;  %v616_v5 = vadd.f32 -0.28449672, %v598_v12  ;;  %v484_v56 = vadd.f32 1.0, %v466_v50  ;;  %vm807_vm8 = vcmp.lt.f32.partialorder %v1212_v2, 0.0 }
 0x10e   :  { %v679_v37 = vmul.f32 %v1227_v7, %v661_v3  ;;  %v626_v19 = vadd.f32 -0.28449672, %v608_v55  ;;  %v599_v54 = vmul.f32 %v1275_v43, %v581_v42  ;;  %v573_v38 = vmul.f32 %v1286_v9, %v555_v6 }
 0x10f   :  { %v759_v0 = vmul.f32 %v960_v49, %v669_v47  ;;  %v634_v14 = vmul.f32 %v1258_v26, %v616_v5  ;;  %v1302_v7 = vmul.f32 0.5, %v1176_v23  ;;  %977 = vrcp.f32 %v484_v56 }
 0x110   :  { %v769_v32 = vmul.f32 %v966_v27, %v679_v37  ;;  %v644_v8 = vmul.f32 %v1268_v31, %v626_v19  ;;  %v617_v49 = vadd.f32 -0.28449672, %v599_v54  ;;  %v972_v27 = vpop.eup %971  ;;  %v591_v47 = vadd.f32 1.4214138, %v573_v38 }
 0x111   :  { %v777_v57 = vsub.f32 1.0, %v759_v0  ;;  %v652_v12 = vadd.f32 0.2548296, %v634_v14  ;;  %v700_v55 = vmul.f32 %v448_v13, %v448_v13  ;;  %v1308_v50 = vpop.eup %973  ;;  %979 = vpow2.f32 %v729_v51 }
 0x112   :  { %v787_v3 = vsub.f32 1.0, %v769_v32  ;;  %v662_v48 = vadd.f32 0.2548296, %v644_v8  ;;  %v635_v56 = vmul.f32 %v1275_v43, %v617_v49  ;;  %v976_v32 = vpop.eup %975  ;;  %v609_v5 = vmul.f32 %v1286_v9, %v591_v47 }
 0x113   :  { %v813_v20 = vsub.f32 0.0, %v777_v57  ;;  %v670_v23 = vmul.f32 %v1258_v26, %v652_v12  ;;  %v528_v13 = vmul.f32 1.0614054, %v1308_v50  ;;  %v1324_v8 = vmul.f32 0.70710677, %v1305_v60 }
 0x114   :  { %v823_v19 = vsub.f32 0.0, %v787_v3  ;;  %v680_v37 = vmul.f32 %v1268_v31, %v662_v48  ;;  %v653_v0 = vadd.f32 0.2548296, %v635_v56  ;;  %v627_v51 = vadd.f32 -0.28449672, %v609_v5 }
 0x115   :  { %v831_v46 = vsel %vm795_vm3, %v813_v20, %v777_v57  ;;  %v760_v26 = vmul.f32 %v968_v25, %v670_v23  ;;  %v546_v38 = vadd.f32 -1.4531521, %v528_v13  ;;  %v439_v20 = vand.u32 2147483647, %v1324_v8 }
 0x116   :  { %v849_v42 = vadd.f32 1.0, %v831_v46  ;;  %v841_v6 = vsel %vm805_vm4, %v823_v19, %v787_v3  ;;  %v770_v54 = vmul.f32 %v970_v34, %v680_v37  ;;  %v671_v31 = vmul.f32 %v1275_v43, %v653_v0 }
 0x117   :  { %v859_v14 = vadd.f32 1.0, %v841_v6  ;;  %v778_v57 = vsub.f32 1.0, %v760_v26  ;;  %v645_v25 = vmul.f32 %v1286_v9, %v627_v51  ;;  %v564_v3 = vmul.f32 %v1308_v50, %v546_v38 }
 0x118   :  { %v867_v52 = vmul.f32 %v849_v42, %v1202_v58  ;;  %v788_v53 = vsub.f32 1.0, %v770_v54  ;;  %v761_v49 = vmul.f32 %v972_v27, %v671_v31  ;;  %v718_v58 = vsub.f32 0.0, %v700_v55 }
 0x119   :  { %v877_v12 = vmul.f32 %v859_v14, %v1209_v63  ;;  %v814_v34 = vsub.f32 0.0, %v778_v57  ;;  %v1333_v43 = vpop.eup %977  ;;  %v663_v48 = vadd.f32 0.2548296, %v645_v25  ;;  %v582_v47 = vadd.f32 1.4214138, %v564_v3 }
 0x11a   :  { %885 = vst [vmem:[%s1605_s4] sm:$0xff] %v867_v52  ;;  %v824_v63 = vsub.f32 0.0, %v788_v53  ;;  %v345_v19 = vadd.f32 %v1266_v24, %v1154_v1  ;;  %v779_v56 = vsub.f32 1.0, %v761_v49  ;;  %v538_v27 = vmul.f32 1.0614054, %v1333_v43 }
 0x11b   :  { %895 = vst [vmem:[%s1605_s4 + $0x50] sm:$0xff] %v877_v12  ;;  %v832_v23 = vsel %vm796_vm5, %v814_v34, %v778_v57  ;;  %v457_v55 = vmul.f32 0.3275911, %v439_v20  ;;  %v681_v5 = vmul.f32 %v1286_v9, %v663_v48  ;;  %v600_v13 = vmul.f32 %v1308_v50, %v582_v47  ;;  %v980_v42 = vpop.eup %979 }
 0x11c   :  { %v850_v46 = vadd.f32 1.0, %v832_v23  ;;  %v842_v37 = vsel %vm806_vm6, %v824_v63, %v788_v53  ;;  %v815_v26 = vsub.f32 0.0, %v779_v56  ;;  %v556_v0 = vadd.f32 -1.4531521, %v538_v27 }
 0x11d   :  { %v860_v6 = vadd.f32 1.0, %v842_v37  ;;  %v475_v1 = vadd.f32 1.0, %v457_v55  ;;  %v771_v24 = vmul.f32 %v976_v32, %v681_v5  ;;  %v618_v14 = vadd.f32 -0.28449672, %v600_v13 }
 0x11e   :  { %v868_v17 = vmul.f32 %v850_v46, %v1217_v4  ;;  %v749_v54 = vmul.f32 1.442695, %v718_v58  ;;  %v833_v21 = vsel %vm797_vm7, %v815_v26, %v779_v56  ;;  %v574_v38 = vmul.f32 %v1333_v43, %v556_v0 }
 0x11f   :  { %v878_v51 = vmul.f32 %v860_v6, %v1219_v44  ;;  %981 = vrcp.f32 %v475_v1  ;;  %v851_v9 = vadd.f32 1.0, %v833_v21  ;;  %v789_v52 = vsub.f32 1.0, %v771_v24 }
 0x120   :  { %886 = vst [vmem:[%s1605_s4 + $0x8] sm:$0xff] %v868_v17  ;;  %v636_v4 = vmul.f32 %v1308_v50, %v618_v14  ;;  %v592_v44 = vadd.f32 1.4214138, %v574_v38  ;;  %v370_v30 = vmul.f32 %v1106_v29, %v345_v19  ;;  %v287_v32 = vrot.slane %v1192_v40, 1 }
 0x121   :  { %896 = vst [vmem:[%s1605_s4 + $0x58] sm:$0xff] %v878_v51  ;;  %v307_v57 = vrot.slane %v1194_v41, 1  ;;  %v869_v31 = vmul.f32 %v851_v9, %v1302_v7  ;;  %v825_v12 = vsub.f32 0.0, %v789_v52  ;;  %983 = vpow2.f32 %v749_v54  ;;  %v1622_v41 = vld [vmem:[#allocation4_spill] sm:$0xff] }
 0x122   :  { %v654_v53 = vadd.f32 0.2548296, %v636_v4  ;;  %v610_v25 = vmul.f32 %v1333_v43, %v592_v44  ;;  %v1366_v3 = vadd.f32 %v1114_v33, %v370_v30  ;;  %v1619_v34 = vrot.slane %v1167_v15, 1 }
 0x123   :  { %v1620_v40 = vrot.slane %v1169_v16, 1  ;;  %887 = vst [vmem:[%s1605_s4 + $0x10] sm:$0xff] %v869_v31  ;;  %v411_v7 = vmul.f32 0.5, %v1190_v39  ;;  %v843_v63 = vsel %vm807_vm8, %v825_v12, %v789_v52  ;;  %v691_v23 = vmul.f32 %v439_v20, %v439_v20 }
 0x124   :  { %v288_v49 = vsel %vm275_vm2, %v1619_v34, %v287_v32  ;;  %v672_v48 = vmul.f32 %v1308_v50, %v654_v53  ;;  %v861_v47 = vadd.f32 1.0, %v843_v63  ;;  %v628_v19 = vadd.f32 -0.28449672, %v610_v25 }
 0x125   :  { %v308_v58 = vsel %vm275_vm2, %v1620_v40, %v307_v57  ;;  %v336_v15 = vadd.f32 %v288_v49, %v1163_v10  ;;  %v1385_v16 = vmul.f32 0.70710677, %v1366_v3  ;;  %v289_v39 = vrot.slane %v1204_v61, 1 }
 0x126   :  { %v762_v56 = vmul.f32 %v980_v42, %v672_v48  ;;  %v346_v55 = vadd.f32 %v308_v58, %v1165_v11  ;;  %v879_v46 = vmul.f32 %v861_v47, %v411_v7  ;;  %v646_v2 = vmul.f32 %v1333_v43, %v628_v19 }
 0x127   :  { %v361_v27 = vmul.f32 %v1106_v29, %v336_v15  ;;  %v449_v50 = vand.u32 2147483647, %v1385_v16  ;;  %v290_v5 = vsel %vm275_vm2, %v287_v32, %v289_v39  ;;  %v709_v42 = vsub.f32 0.0, %v691_v23 }
 0x128   :  { %v780_v37 = vsub.f32 1.0, %v762_v56  ;;  %v371_v20 = vmul.f32 %v1106_v29, %v346_v55  ;;  %897 = vst [vmem:[%s1605_s4 + $0x60] sm:$0xff] %v879_v46  ;;  %v664_v11 = vadd.f32 0.2548296, %v646_v2  ;;  %v337_v26 = vadd.f32 %v290_v5, %v1184_v35 }
 0x129   :  { %v1393_v10 = vadd.f32 %v1114_v33, %v361_v27  ;;  %v1399_v13 = vpop.eup %981  ;;  %v467_v6 = vmul.f32 0.3275911, %v449_v50  ;;  %vm798_vm9 = vcmp.lt.f32.partialorder %v1255_v45, 0.0  ;;  %v402_v21 = vmul.f32 0.5, %v1243_v59 }
 0x12a   :  { %v816_v0 = vsub.f32 0.0, %v780_v37  ;;  %v529_v1 = vmul.f32 1.0614054, %v1399_v13  ;;  %v682_v24 = vmul.f32 %v1333_v43, %v664_v11  ;;  %v1412_v54 = vadd.f32 %v1114_v33, %v371_v20 }
 0x12b   :  { %v1407_v17 = vmul.f32 0.70710677, %v1393_v10  ;;  %v485_v14 = vadd.f32 1.0, %v467_v6  ;;  %v984_v51 = vpop.eup %983  ;;  %v731_v44 = vmul.f32 1.442695, %v709_v42  ;;  %v701_v45 = vmul.f32 %v449_v50, %v449_v50 }
 0x12c   :  { %v834_v38 = vsel %vm798_vm9, %v816_v0, %v780_v37  ;;  %v547_v9 = vadd.f32 -1.4531521, %v529_v1  ;;  %v772_v4 = vmul.f32 %v984_v51, %v682_v24  ;;  %v1418_v12 = vmul.f32 0.70710677, %v1412_v54  ;;  %v1623_v1 = vld [vmem:[#allocation6_spill] sm:$0xff] }
 0x12d   :  { %v440_v35 = vand.u32 2147483647, %v1407_v17  ;;  %v852_v52 = vadd.f32 1.0, %v834_v38  ;;  %985 = vrcp.f32 %v485_v14  ;;  %vm808_vm10 = vcmp.lt.f32.partialorder %v1278_v22, 0.0 }
 0x12e   :  { %v565_v30 = vmul.f32 %v1399_v13, %v547_v9  ;;  %v790_v31 = vsub.f32 1.0, %v772_v4  ;;  %v362_v25 = vmul.f32 %v1106_v29, %v337_v26  ;;  %987 = vpow2.f32 %v731_v44 }
 0x12f   :  { %v458_v32 = vmul.f32 0.3275911, %v440_v35  ;;  %v870_v43 = vmul.f32 %v852_v52, %v402_v21  ;;  %v450_v49 = vand.u32 2147483647, %v1418_v12  ;;  %v309_v40 = vrot.slane %v1206_v62, 1 }
 0x130   :  { %v583_v59 = vadd.f32 1.4214138, %v565_v30  ;;  %v826_v34 = vsub.f32 0.0, %v790_v31  ;;  %v719_v7 = vsub.f32 0.0, %v701_v45  ;;  %v1429_v22 = vadd.f32 %v1114_v33, %v362_v25 }
 0x131   :  { %v476_v53 = vadd.f32 1.0, %v458_v32  ;;  %888 = vst [vmem:[%s1605_s4 + $0x18] sm:$0xff] %v870_v43  ;;  %v692_v48 = vmul.f32 %v440_v35, %v440_v35  ;;  %v468_v15 = vmul.f32 0.3275911, %v450_v49  ;;  %v310_v47 = vsel %vm275_vm2, %v307_v57, %v309_v40 }
 0x132   :  { %v601_v58 = vmul.f32 %v1399_v13, %v583_v59  ;;  %v844_v63 = vsel %vm808_vm10, %v826_v34, %v790_v31  ;;  %v412_v19 = vmul.f32 0.5, %v1261_v28  ;;  %v1436_v62 = vmul.f32 0.70710677, %v1429_v22 }
 0x133   :  { %989 = vrcp.f32 %v476_v53  ;;  %v862_v23 = vadd.f32 1.0, %v844_v63  ;;  %v486_v27 = vadd.f32 1.0, %v468_v15  ;;  %v1621_v55 = vrot.slane %v1094_v18, 1 }
 0x134   :  { %v619_v56 = vadd.f32 -0.28449672, %v601_v58  ;;  %v347_v37 = vadd.f32 %v310_v47, %v1186_v36  ;;  %v751_v28 = vmul.f32 1.442695, %v719_v7  ;;  %v710_v5 = vsub.f32 0.0, %v692_v48 }
 0x135   :  { %v330_v46 = vsel %vm275_vm2, %v309_v40, %v1621_v55  ;;  %v880_v2 = vmul.f32 %v862_v23, %v412_v19  ;;  %991 = vrcp.f32 %v486_v27  ;;  %v441_v11 = vand.u32 2147483647, %v1436_v62  ;;  %v1625_v19 = vld [vmem:[#allocation8_spill] sm:$0xff] }
 0x136   :  { %v637_v50 = vmul.f32 %v1399_v13, %v619_v56  ;;  %v348_v20 = vadd.f32 %v330_v46, %v1622_v41  ;;  %v372_v6 = vmul.f32 %v1106_v29, %v347_v37  ;;  %v702_v26 = vmul.f32 %v450_v49, %v450_v49 }
 0x137   :  { %v1444_v57 = vpop.eup %985  ;;  %898 = vst [vmem:[%s1605_s4 + $0x68] sm:$0xff] %v880_v2  ;;  %v459_v0 = vmul.f32 0.3275911, %v441_v11  ;;  %v291_v24 = vrot.slane %v1623_v1, 1  ;;  %v733_v35 = vmul.f32 1.442695, %v710_v5  ;;  %993 = vpow2.f32 %v751_v28 }
 0x138   :  { %v655_v18 = vadd.f32 0.2548296, %v637_v50  ;;  %v539_v42 = vmul.f32 1.0614054, %v1444_v57  ;;  %v373_v36 = vmul.f32 %v1106_v29, %v348_v20  ;;  %v1456_v21 = vadd.f32 %v1114_v33, %v372_v6  ;;  %v988_v9 = vpop.eup %987 }
 0x139   :  { %v477_v52 = vadd.f32 1.0, %v459_v0  ;;  %v292_v4 = vsel %vm275_vm2, %v289_v39, %v291_v24  ;;  %v720_v43 = vsub.f32 0.0, %v702_v26  ;;  %v1624_v39 = vld [vmem:[#allocation3_spill] sm:$0xff]  ;;  %vm799_vm11 = vcmp.lt.f32.partialorder %v1324_v8, 0.0 }
 0x13a   :  { %v673_v14 = vmul.f32 %v1399_v13, %v655_v18  ;;  %v557_v51 = vadd.f32 -1.4531521, %v539_v42  ;;  %v1459_v38 = vadd.f32 %v1114_v33, %v373_v36  ;;  %v403_v13 = vmul.f32 0.5, %v1305_v60 }
 0x13b   :  { %995 = vrcp.f32 %v477_v52  ;;  %v1472_v31 = vmul.f32 0.70710677, %v1456_v21  ;;  %v338_v25 = vadd.f32 %v292_v4, %v1624_v39  ;;  %v693_v58 = vmul.f32 %v441_v11, %v441_v11 }
 0x13c   :  { %v763_v30 = vmul.f32 %v988_v9, %v673_v14  ;;  %v575_v45 = vmul.f32 %v1444_v57, %v557_v51  ;;  %v1475_v61 = vmul.f32 0.70710677, %v1459_v38  ;;  %997 = vpow2.f32 %v733_v35 }
 0x13d   :  { %v1466_v44 = vpop.eup %989  ;;  %v451_v34 = vand.u32 2147483647, %v1472_v31  ;;  %v753_v15 = vmul.f32 1.442695, %v720_v43  ;;  %v293_v23 = vrot.slane %v1625_v19, 1  ;;  %v363_v37 = vmul.f32 %v1106_v29, %v338_v25  ;;  %v1626_v25 = vld [vmem:[#allocation2_spill] sm:$0xff] }
 0x13e   :  { %v530_v32 = vmul.f32 1.0614054, %v1466_v44  ;;  %v781_v59 = vsub.f32 1.0, %v763_v30  ;;  %v593_v53 = vadd.f32 1.4214138, %v575_v45  ;;  %v711_v28 = vsub.f32 0.0, %v693_v58 }
 0x13f   :  { %v452_v7 = vand.u32 2147483647, %v1475_v61  ;;  %v1482_v63 = vpop.eup %991  ;;  %v469_v47 = vmul.f32 0.3275911, %v451_v34  ;;  %v703_v42 = vmul.f32 %v451_v34, %v451_v34  ;;  %v413_v36 = vmul.f32 0.5, %v1366_v3 }
 0x140   :  { %v548_v60 = vadd.f32 -1.4531521, %v530_v32  ;;  %v817_v49 = vsub.f32 0.0, %v781_v59  ;;  %v611_v40 = vmul.f32 %v1444_v57, %v593_v53  ;;  %v540_v27 = vmul.f32 1.0614054, %v1482_v63 }
 0x141   :  { %v470_v55 = vmul.f32 0.3275911, %v452_v7  ;;  %v487_v50 = vadd.f32 1.0, %v469_v47  ;;  %v994_v6 = vpop.eup %993  ;;  %vm809_vm12 = vcmp.lt.f32.partialorder %v1385_v16, 0.0  ;;  %v704_v9 = vmul.f32 %v452_v7, %v452_v7  ;;  %v1629_v47 = vld [vmem:[#allocation7_spill] sm:$0xff] }
 0x142   :  { %v566_v48 = vmul.f32 %v1466_v44, %v548_v60  ;;  %v835_v56 = vsel %vm799_vm11, %v817_v49, %v781_v59  ;;  %v629_v8 = vadd.f32 -0.28449672, %v611_v40  ;;  %v558_v20 = vadd.f32 -1.4531521, %v540_v27  ;;  %v1628_v40 = vld [vmem:[#allocation5_spill] sm:$0xff] }
 0x143   :  { %v853_v46 = vadd.f32 1.0, %v835_v56  ;;  %v488_v5 = vadd.f32 1.0, %v470_v55  ;;  %999 = vrcp.f32 %v487_v50  ;;  %v1499_v35 = vadd.f32 %v1114_v33, %v363_v37 }
 0x144   :  { %v584_v2 = vadd.f32 1.4214138, %v566_v48  ;;  %v647_v41 = vmul.f32 %v1444_v57, %v629_v8  ;;  %v576_v0 = vmul.f32 %v1482_v63, %v558_v20  ;;  %v294_v3 = vsel %vm275_vm2, %v291_v24, %v293_v23 }
 0x145   :  { %v871_v11 = vmul.f32 %v853_v46, %v403_v13  ;;  %1001 = vrcp.f32 %v488_v5  ;;  %v1492_v14 = vpop.eup %995  ;;  %v735_v32 = vmul.f32 1.442695, %v711_v28  ;;  %v721_v43 = vsub.f32 0.0, %v703_v42 }
 0x146   :  { %v602_v18 = vmul.f32 %v1466_v44, %v584_v2  ;;  %v665_v26 = vadd.f32 0.2548296, %v647_v41  ;;  %v594_v4 = vadd.f32 1.4214138, %v576_v0  ;;  %1003 = vpow2.f32 %v753_v15  ;;  %v998_v30 = vpop.eup %997 }
 0x147   :  { %889 = vst [vmem:[%s1605_s4 + $0x20] sm:$0xff] %v871_v11  ;;  %v531_v13 = vmul.f32 1.0614054, %v1492_v14  ;;  %v1508_v59 = vmul.f32 0.70710677, %v1499_v35  ;;  %v1627_v24 = vrot.slane %v1626_v25, 1  ;;  %v339_v58 = vadd.f32 %v294_v3, %v1628_v40 }
 0x148   :  { %v620_v51 = vadd.f32 -0.28449672, %v602_v18  ;;  %v683_v52 = vmul.f32 %v1444_v57, %v665_v26  ;;  %v612_v39 = vmul.f32 %v1482_v63, %v594_v4  ;;  %v722_v34 = vsub.f32 0.0, %v704_v9 }
 0x149   :  { %v549_v1 = vadd.f32 -1.4531521, %v531_v13  ;;  %v296_v57 = vsel %vm275_vm2, %v293_v23, %v1627_v24  ;;  %v442_v49 = vand.u32 2147483647, %v1508_v59  ;;  %vm800_vm13 = vcmp.lt.f32.partialorder %v1407_v17, 0.0 }
 0x14a   :  { %v638_v45 = vmul.f32 %v1466_v44, %v620_v51  ;;  %v773_v53 = vmul.f32 %v994_v6, %v683_v52  ;;  %v630_v48 = vadd.f32 -0.28449672, %v612_v39  ;;  %v340_v19 = vadd.f32 %v296_v57, %v1629_v47 }
 0x14b   :  { %v567_v15 = vmul.f32 %v1492_v14, %v549_v1  ;;  %1005 = vpow2.f32 %v735_v32  ;;  %v755_v8 = vmul.f32 1.442695, %v721_v43  ;;  %v460_v27 = vmul.f32 0.3275911, %v442_v49 }
 0x14c   :  { %v656_v60 = vadd.f32 0.2548296, %v638_v45  ;;  %v791_v7 = vsub.f32 1.0, %v773_v53  ;;  %v648_v55 = vmul.f32 %v1482_v63, %v630_v48  ;;  %v364_v2 = vmul.f32 %v1106_v29, %v339_v58 }
 0x14d   :  { %v585_v46 = vadd.f32 1.4214138, %v567_v15  ;;  %v1522_v50 = vpop.eup %999  ;;  %v757_v41 = vmul.f32 1.442695, %v722_v34  ;;  %v478_v20 = vadd.f32 1.0, %v460_v27  ;;  %v365_v28 = vmul.f32 %v1106_v29, %v340_v19 }
 0x14e   :  { %v674_v56 = vmul.f32 %v1466_v44, %v656_v60  ;;  %v827_v23 = vsub.f32 0.0, %v791_v7  ;;  %v666_v11 = vadd.f32 0.2548296, %v648_v55  ;;  %v541_v42 = vmul.f32 1.0614054, %v1522_v50 }
 0x14f   :  { %v1525_v5 = vpop.eup %1001  ;;  %v603_v18 = vmul.f32 %v1492_v14, %v585_v46  ;;  %1007 = vrcp.f32 %v478_v20  ;;  %v1534_v52 = vadd.f32 %v1114_v33, %v364_v2  ;;  %v694_v60 = vmul.f32 %v442_v49, %v442_v49 }
 0x150   :  { %v764_v37 = vmul.f32 %v998_v30, %v674_v56  ;;  %v845_v44 = vsel %vm809_vm12, %v827_v23, %v791_v7  ;;  %v542_v0 = vmul.f32 1.0614054, %v1525_v5  ;;  %v1004_v51 = vpop.eup %1003  ;;  %v684_v9 = vmul.f32 %v1482_v63, %v666_v11 }
 0x151   :  { %v863_v6 = vadd.f32 1.0, %v845_v44  ;;  %v621_v3 = vadd.f32 -0.28449672, %v603_v18  ;;  %v559_v29 = vadd.f32 -1.4531521, %v541_v42  ;;  %v1537_v30 = vadd.f32 %v1114_v33, %v365_v28 }
 0x152   :  { %v782_v26 = vsub.f32 1.0, %v764_v37  ;;  %v560_v13 = vadd.f32 -1.4531521, %v542_v0  ;;  %v774_v45 = vmul.f32 %v1004_v51, %v684_v9  ;;  %1009 = vpow2.f32 %v755_v8 }
 0x153   :  { %v881_v16 = vmul.f32 %v863_v6, %v413_v36  ;;  %v639_v32 = vmul.f32 %v1492_v14, %v621_v3  ;;  %v577_v43 = vmul.f32 %v1522_v50, %v559_v29  ;;  %v404_v63 = vmul.f32 0.5, %v1393_v10 }
 0x154   :  { %v818_v4 = vsub.f32 0.0, %v782_v26  ;;  %v578_v53 = vmul.f32 %v1525_v5, %v560_v13  ;;  %1011 = vpow2.f32 %v757_v41  ;;  %v792_v39 = vsub.f32 1.0, %v774_v45 }
 0x155   :  { %899 = vst [vmem:[%s1605_s4 + $0x70] sm:$0xff] %v881_v16  ;;  %v657_v1 = vadd.f32 0.2548296, %v639_v32  ;;  %v595_v25 = vadd.f32 1.4214138, %v577_v43  ;;  %v1006_v24 = vpop.eup %1005  ;;  %vm810_vm14 = vcmp.lt.f32.partialorder %v1418_v12, 0.0 }
 0x156   :  { %v836_v36 = vsel %vm800_vm13, %v818_v4, %v782_v26  ;;  %v596_v57 = vadd.f32 1.4214138, %v578_v53  ;;  %v1549_v34 = vmul.f32 0.70710677, %v1534_v52  ;;  %v1552_v40 = vmul.f32 0.70710677, %v1537_v30 }
 0x157   :  { %v854_v33 = vadd.f32 1.0, %v836_v36  ;;  %v828_v58 = vsub.f32 0.0, %v792_v39  ;;  %v675_v17 = vmul.f32 %v1492_v14, %v657_v1  ;;  %v613_v7 = vmul.f32 %v1522_v50, %v595_v25 }
 0x158   :  { %v614_v48 = vmul.f32 %v1525_v5, %v596_v57  ;;  %v443_v15 = vand.u32 2147483647, %v1549_v34  ;;  %v444_v49 = vand.u32 2147483647, %v1552_v40  ;;  %v414_v47 = vmul.f32 0.5, %v1412_v54 }
 0x159   :  { %v872_v10 = vmul.f32 %v854_v33, %v404_v63  ;;  %v846_v19 = vsel %vm810_vm14, %v828_v58, %v792_v39  ;;  %v765_v56 = vmul.f32 %v1006_v24, %v675_v17  ;;  %v631_v8 = vadd.f32 -0.28449672, %v613_v7  ;;  %v1008_v14 = vpop.eup %1007 }
 0x15a   :  { %v864_v27 = vadd.f32 1.0, %v846_v19  ;;  %v632_v23 = vadd.f32 -0.28449672, %v614_v48  ;;  %v712_v55 = vsub.f32 0.0, %v694_v60  ;;  %v461_v12 = vmul.f32 0.3275911, %v443_v15 }
 0x15b   :  { %890 = vst [vmem:[%s1605_s4 + $0x28] sm:$0xff] %v872_v10  ;;  %v783_v46 = vsub.f32 1.0, %v765_v56  ;;  %v649_v2 = vmul.f32 %v1522_v50, %v631_v8  ;;  %v532_v37 = vmul.f32 1.0614054, %v1008_v14  ;;  %v462_v41 = vmul.f32 0.3275911, %v444_v49 }
 0x15c   :  { %v882_v20 = vmul.f32 %v864_v27, %v414_v47  ;;  %v650_v28 = vmul.f32 %v1525_v5, %v632_v23  ;;  %v479_v44 = vadd.f32 1.0, %v461_v12  ;;  %v1010_v11 = vpop.eup %1009  ;;  %vm801_vm15 = vcmp.lt.f32.partialorder %v1436_v62, 0.0 }
 0x15d   :  { %v819_v18 = vsub.f32 0.0, %v783_v46  ;;  %v667_v54 = vadd.f32 0.2548296, %v649_v2  ;;  %v550_v42 = vadd.f32 -1.4531521, %v532_v37  ;;  %v480_v6 = vadd.f32 1.0, %v462_v41 }
 0x15e   :  { %v1012_v26 = vpop.eup %1011  ;;  %900 = vst [vmem:[%s1605_s4 + $0x78] sm:$0xff] %v882_v20  ;;  %v668_v0 = vadd.f32 0.2548296, %v650_v28  ;;  %v737_v51 = vmul.f32 1.442695, %v712_v55  ;;  %1013 = vrcp.f32 %v479_v44  ;;  %v405_v16 = vmul.f32 0.5, %v1429_v22 }
 0x15f   :  { %v837_v9 = vsel %vm801_vm15, %v819_v18, %v783_v46  ;;  %v685_v3 = vmul.f32 %v1522_v50, %v667_v54  ;;  %v568_v29 = vmul.f32 %v1008_v14, %v550_v42  ;;  %1015 = vrcp.f32 %v480_v6 }
 0x160   :  { %v855_v4 = vadd.f32 1.0, %v837_v9  ;;  %v686_v13 = vmul.f32 %v1525_v5, %v668_v0  ;;  %1017 = vpow2.f32 %v737_v51  ;;  %v695_v50 = vmul.f32 %v443_v15, %v443_v15 }
 0x161   :  { %v775_v45 = vmul.f32 %v1010_v11, %v685_v3  ;;  %v586_v32 = vadd.f32 1.4214138, %v568_v29  ;;  %v696_v1 = vmul.f32 %v444_v49, %v444_v49  ;;  %vm811_vm0 = vcmp.lt.f32.partialorder %v1472_v31, 0.0 }
 0x162   :  { %v873_v43 = vmul.f32 %v855_v4, %v405_v16  ;;  %v776_v63 = vmul.f32 %v1012_v26, %v686_v13  ;;  %v415_v5 = vmul.f32 0.5, %v1456_v21  ;;  %vm812_vm1 = vcmp.lt.f32.partialorder %v1475_v61, 0.0 }
 0x163   :  { %v793_v36 = vsub.f32 1.0, %v775_v45  ;;  %v604_v62 = vmul.f32 %v1008_v14, %v586_v32  ;;  %v416_v60 = vmul.f32 0.5, %v1459_v38  ;;  %v713_v17 = vsub.f32 0.0, %v695_v50 }
 0x164   :  { %891 = vst [vmem:[%s1605_s4 + $0x30] sm:$0xff] %v873_v43  ;;  %v794_v53 = vsub.f32 1.0, %v776_v63  ;;  %v714_v49 = vsub.f32 0.0, %v696_v1  ;;  %vm802_vm2 = vcmp.lt.f32.partialorder %v1508_v59, 0.0  ;;  %v406_v18 = vmul.f32 0.5, %v1499_v35 }
 0x165   :  { %v829_v33 = vsub.f32 0.0, %v793_v36  ;;  %v622_v39 = vadd.f32 -0.28449672, %v604_v62  ;;  %v739_v38 = vmul.f32 1.442695, %v713_v17  ;;  %vm803_vm3 = vcmp.lt.f32.partialorder %v1549_v34, 0.0 }
 0x166   :  { %v830_v22 = vsub.f32 0.0, %v794_v53  ;;  %v741_v12 = vmul.f32 1.442695, %v714_v49  ;;  %vm804_vm4 = vcmp.lt.f32.partialorder %v1552_v40, 0.0  ;;  %v408_v50 = vmul.f32 0.5, %v1537_v30 }
 0x167   :  { %v847_v25 = vsel %vm811_vm0, %v829_v33, %v793_v36  ;;  %v640_v24 = vmul.f32 %v1008_v14, %v622_v39  ;;  %1019 = vpow2.f32 %v739_v38  ;;  %v407_v36 = vmul.f32 0.5, %v1534_v52 }
 0x168   :  { %v1014_v57 = vpop.eup %1013  ;;  %v848_v10 = vsel %vm812_vm1, %v830_v22, %v794_v53  ;;  %v865_v58 = vadd.f32 1.0, %v847_v25  ;;  %1021 = vpow2.f32 %v741_v12 }
 0x169   :  { %v1016_v7 = vpop.eup %1015  ;;  %v866_v48 = vadd.f32 1.0, %v848_v10  ;;  %v658_v15 = vadd.f32 0.2548296, %v640_v24  ;;  %v533_v47 = vmul.f32 1.0614054, %v1014_v57 }
 0x16a   :  { %v883_v19 = vmul.f32 %v865_v58, %v415_v5  ;;  %v534_v31 = vmul.f32 1.0614054, %v1016_v7  ;;  %v1018_v27 = vpop.eup %1017 }
 0x16b   :  { %v884_v56 = vmul.f32 %v866_v48, %v416_v60  ;;  %v676_v8 = vmul.f32 %v1008_v14, %v658_v15  ;;  %v551_v21 = vadd.f32 -1.4531521, %v533_v47 }
 0x16c   :  { %901 = vst [vmem:[%s1605_s4 + $0x80] sm:$0xff] %v883_v19  ;;  %v552_v61 = vadd.f32 -1.4531521, %v534_v31 }
 0x16d   :  { %902 = vst [vmem:[%s1605_s4 + $0x88] sm:$0xff] %v884_v56  ;;  %v766_v23 = vmul.f32 %v1018_v27, %v676_v8  ;;  %v569_v55 = vmul.f32 %v1014_v57, %v551_v21 }
 0x16e   :  { %v570_v46 = vmul.f32 %v1016_v7, %v552_v61 }
 0x16f   :  { %v784_v2 = vsub.f32 1.0, %v766_v23  ;;  %v587_v37 = vadd.f32 1.4214138, %v569_v55 }
 0x170   :  { %v588_v41 = vadd.f32 1.4214138, %v570_v46 }
 0x171   :  { %v820_v14 = vsub.f32 0.0, %v784_v2  ;;  %v605_v20 = vmul.f32 %v1014_v57, %v587_v37  ;;  %v1020_v29 = vpop.eup %1019 }
 0x172   :  { %v606_v28 = vmul.f32 %v1016_v7, %v588_v41  ;;  %v1022_v59 = vpop.eup %1021 }
 0x173   :  { %v838_v44 = vsel %vm802_vm2, %v820_v14, %v784_v2  ;;  %v623_v11 = vadd.f32 -0.28449672, %v605_v20 }
 0x174   :  { %v856_v54 = vadd.f32 1.0, %v838_v44  ;;  %v624_v42 = vadd.f32 -0.28449672, %v606_v28 }
 0x175   :  { %v641_v6 = vmul.f32 %v1014_v57, %v623_v11 }
 0x176   :  { %v874_v26 = vmul.f32 %v856_v54, %v406_v18  ;;  %v642_v0 = vmul.f32 %v1016_v7, %v624_v42 }
 0x177   :  { %v659_v51 = vadd.f32 0.2548296, %v641_v6 }
 0x178   :  { %892 = vst [vmem:[%s1605_s4 + $0x38] sm:$0xff] %v874_v26  ;;  %v660_v9 = vadd.f32 0.2548296, %v642_v0 }
 0x179   :  { %v677_v3 = vmul.f32 %v1014_v57, %v659_v51 }
 0x17a   :  { %v678_v16 = vmul.f32 %v1016_v7, %v660_v9 }
 0x17b   :  { %v767_v4 = vmul.f32 %v1020_v29, %v677_v3 }
 0x17c   :  { %v768_v13 = vmul.f32 %v1022_v59, %v678_v16 }
 0x17d   :  { %v785_v45 = vsub.f32 1.0, %v767_v4 }
 0x17e   :  { %v786_v32 = vsub.f32 1.0, %v768_v13 }
 0x17f   :  { %v821_v35 = vsub.f32 0.0, %v785_v45 }
 0x180   :  { %v822_v43 = vsub.f32 0.0, %v786_v32 }
 0x181   :  { %v839_v63 = vsel %vm803_vm3, %v821_v35, %v785_v45 }
 0x182   :  { %v840_v62 = vsel %vm804_vm4, %v822_v43, %v786_v32  ;;  %v857_v53 = vadd.f32 1.0, %v839_v63 }
 0x183   :  { %v858_v33 = vadd.f32 1.0, %v840_v62 }
 0x184   :  { %v875_v39 = vmul.f32 %v857_v53, %v407_v36 }
 0x185   :  { %v876_v1 = vmul.f32 %v858_v33, %v408_v50 }
 0x186   :  { %893 = vst [vmem:[%s1605_s4 + $0x40] sm:$0xff] %v875_v39 }
 0x187   :  { %894 = vst [vmem:[%s1605_s4 + $0x48] sm:$0xff] %v876_v1 }

</bundles_post_ra>
